<compile_context>
chip_gen: v7x
topology: tpu7x:2x2x1
jax: 0.10.0
libtpu: 0.0.40
codegen_flags: <defaults>
</compile_context>

<pallas_src>
import jax
import jax.numpy as jnp
from jax.experimental import pallas as pl
from jax.experimental.pallas import tpu as pltpu


def _round_up(x, m):
    return (x + m - 1) // m * m


def _embed_onehot_kernel(idx_ref, table_ref, out_ref):
    # idx_ref  : (TILE_N, 1)    int32 VMEM block of speaker ids
    # table_ref: (S_pad, D_pad) VMEM, resident across grid steps (constant index_map)
    # out_ref  : (TILE_N, D_pad) VMEM output block
    idx = idx_ref[...]                                         # (TILE_N, 1)
    tile_n = idx.shape[0]
    s_pad = table_ref.shape[0]
    # One-hot gather as a single MXU matmul per tile (exact: selects one row,
    # accumulates in f32). VPU builds the mask, MXU does the "gather".
    iota = jax.lax.broadcasted_iota(jnp.int32, (tile_n, s_pad), 1)
    onehot = (iota == idx).astype(table_ref.dtype)             # (TILE_N, S_pad)
    out_ref[...] = jnp.dot(
        onehot, table_ref[...], preferred_element_type=jnp.float32
    ).astype(out_ref.dtype)


def resemblyzer_table_forward(x, table, *, tile_n=256, force_pallas=False):
    """Equivalent of ResemblyzerTable.forward(x) == table[x] (embedding row gather)."""
    num_speakers, dim = table.shape
    orig_shape = x.shape
    idx = x.reshape(-1).astype(jnp.int32)
    n = idx.shape[0]

    # Tiny problems are pure fixed overhead in a pallas_call; a plain XLA gather
    # fuses into the surrounding graph.  Keep the Pallas path for real workloads.
    if not force_pallas and n * dim * table.dtype.itemsize < (1 << 16):
        return table[x]

    # Hardware-friendly padding.
    s_pad = _round_up(num_speakers, 128)        # clean MXU contraction dim (all gens)
    d_pad = _round_up(dim, 128)                 # lane-dense, unmasked output stores
    tile_n = min(tile_n, _round_up(n, 8))       # >=8-row tiles -> unmasked vst
    n_pad = _round_up(n, tile_n)

    table_p = jnp.zeros((s_pad, d_pad), table.dtype).at[:num_speakers, :dim].set(table)
    idx_p = jnp.zeros((n_pad, 1), jnp.int32).at[:n, 0].set(idx)

    out = pl.pallas_call(
        _embed_onehot_kernel,
        out_shape=jax.ShapeDtypeStruct((n_pad, d_pad), table.dtype),
        grid_spec=pltpu.PrefetchScalarGridSpec(
            num_scalar_prefetch=0,
            grid=(n_pad // tile_n,),
            in_specs=[
                # Per-block index slice as a normal VMEM input (feeds the VPU compare
                # directly; no per-lookup SMEM scalar reads in the index_map).
                pl.BlockSpec((tile_n, 1), lambda i: (i, 0)),
                # Whole (padded) table resident in VMEM: constant block index means
                # the DMA is issued once and reused across all grid steps.
                # TODO(synk): for multi-MiB tables on v7x (64 MiB VMEM), switch to
                # pl.ANY + one manual copy to avoid the redundant second table buffer.
                pl.BlockSpec((s_pad, d_pad), lambda i: (0, 0)),
            ],
            out_specs=pl.BlockSpec((tile_n, d_pad), lambda i: (i, 0)),
        ),
        compiler_params=pltpu.CompilerParams(
            dimension_semantics=("parallel",),
        ),
    )(idx_p, table_p)

    return out[:n, :dim].reshape(*orig_shape, dim)


if __name__ == "__main__":
    key = jax.random.PRNGKey(0)
    k_table, k_idx = jax.random.split(key)

    # Deterministic synthetic stand-in for the d-vector table that the original
    # module builds from speakers.json + per-speaker .npy files.
    num_speakers, dim = 8, 256  # resemblyzer d-vectors are 256-dim
    table = jax.random.normal(k_table, (num_speakers, dim), dtype=jnp.float32)

    # Speaker-id indices (e.g. a batch of utterances): shape (2, 8)
    x = jax.random.randint(k_idx, (2, 8), 0, num_speakers, dtype=jnp.int32)

    # force_pallas=True so the Pallas kernel itself is exercised at toy sizes
    # (the wrapper would otherwise take the XLA-gather fast path).
    y = resemblyzer_table_forward(x, table, force_pallas=True)
    y = jax.block_until_ready(y)

    # Reference: plain JAX gather (== torch nn.Embedding forward)
    ref = table[x]
    assert y.shape == (2, 8, dim), y.shape
    assert y.dtype == jnp.float32
    assert jnp.allclose(y, ref), "mismatch vs reference gather"

    print("KERNEL_OK")
</pallas_src>

<mosaic_0001>
module attributes {stable_mosaic.version = 11 : i64} {
  func.func @_embed_onehot_kernel(%arg0: i32, %arg1: memref<16x1xi32, #tpu.memory_space<vmem>>, %arg2: memref<128x256xf32, #tpu.memory_space<vmem>>, %arg3: memref<16x256xf32, #tpu.memory_space<vmem>>) attributes {dimension_semantics = [#tpu.dimension_semantics<parallel>], iteration_bounds = array<i64: 1>, scalar_prefetch = 0 : i64, scratch_operands = 0 : i64, tpu.core_type = #tpu.core_type<tc>, window_params = [{transform_indices = @transform_0, window_bounds = array<i64: 16, 1>}, {pipeline_mode = #tpu.pipeline_mode<synchronous>, transform_indices = @transform_1, window_bounds = array<i64: 128, 256>}, {transform_indices = @transform_2, window_bounds = array<i64: 16, 256>}]} {
    %c0 = arith.constant 0 : index
    %c0_0 = arith.constant 0 : index
    %0 = vector.load %arg1[%c0, %c0_0] : memref<16x1xi32, #tpu.memory_space<vmem>>, vector<16x1xi32>
    %1 = tpu.iota {dimensions = array<i32: 1>} : vector<16x128xi32>
    %2 = vector.broadcast %0 : vector<16x1xi32> to vector<16x128xi32>
    %3 = arith.cmpi eq, %1, %2 : vector<16x128xi32>
    %4 = arith.extui %3 : vector<16x128xi1> to vector<16x128xi32>
    %5 = arith.sitofp %4 : vector<16x128xi32> to vector<16x128xf32>
    %c0_1 = arith.constant 0 : index
    %c0_2 = arith.constant 0 : index
    %6 = vector.load %arg2[%c0_1, %c0_2] : memref<128x256xf32, #tpu.memory_space<vmem>>, vector<128x256xf32>
    %cst = arith.constant dense<0.000000e+00> : vector<16x256xf32>
    %7 = tpu.matmul %5, %6, %cst {dimension_numbers = #tpu.dot_dimension_numbers<[1], [0], [0], [1], [0, 0, 1, 1], [], []>} : vector<16x128xf32>, vector<128x256xf32>, vector<16x256xf32> -> vector<16x256xf32>
    %c0_3 = arith.constant 0 : index
    %c0_4 = arith.constant 0 : index
    %8 = vector.load %arg3[%c0_3, %c0_4] : memref<16x256xf32, #tpu.memory_space<vmem>>, vector<16x256xf32>
    tpu.vector_store %arg3[%c0_3, %c0_4], %7 {strides = array<i32>} : memref<16x256xf32, #tpu.memory_space<vmem>>, vector<16x256xf32>,
    return
  }
  func.func @transform_0(%arg0: i32) -> (i32, i32) {
    %c0_i32 = arith.constant 0 : i32
    %c0_i32_0 = arith.constant 0 : i32
    return %arg0, %c0_i32 : i32, i32
  }
  func.func @transform_1(%arg0: i32) -> (i32, i32) {
    %c0_i32 = arith.constant 0 : i32
    %c0_i32_0 = arith.constant 0 : i32
    %c0_i32_1 = arith.constant 0 : i32
    return %c0_i32, %c0_i32_0 : i32, i32
  }
  func.func @transform_2(%arg0: i32) -> (i32, i32) {
    %c0_i32 = arith.constant 0 : i32
    %c0_i32_0 = arith.constant 0 : i32
    return %arg0, %c0_i32 : i32, i32
  }
}

</mosaic_0001>

<bundles_post_ra>
// kernel: tpu_custom_call.1
= control target key start
LH: loop header
LB: loop body
LE: loop exit
PB: predicated region body
PF: predicated region fallthrough
CT: control target
= control target key end

     0   :  { %7 = vsyncpa [#allocation3], 0  ;;  %s338_s0 = inlined_call_operand.vmem [shape: s32[16,1], index: 0, kind: input, shape index: {}]   ;;  %s339_s1 = inlined_call_operand.hbm [shape: f32[128,256], index: 1, kind: input, shape index: {}]   ;;  %s340_s2 = inlined_call_operand.hbm [shape: f32[16,256], index: 2, kind: output, shape index: {}]  }
   0x1   :  { %8 = vsyncpa [#allocation4], 0  ;;  %s280_s9 = smov [#allocation2]   ;;  %s232_s13 = scalar_lea.hbm %s339_s1, 4096 }
   0x2   :  { %s16_s10 = sshll.u32 %s280_s9, 4  ;;  %p233_p0 = scmp.ne.s32.totalorder %s339_s1, %s232_s13  ;;  %s17_s10 = int_to_ptr.vmem [resolvable:$true] %s16_s10 }
   0x3   :  { %p236_p1 = scmp.lt.u32.totalorder %s232_s13, %s339_s1 }
   0x5   :  { %p238_p2 = pnand %p236_p1, %p233_p0 }
   0x7   :  { %241 = shalt.err (!%p238_p2)
}
   0x8   :  { %s242_s18 = scalar_lea.vmem %s17_s10, 4096  ;;  %p247_p4 = scmp.lt.s32.totalorder %s17_s10, %s17_s10 }
   0x9   :  { %p243_p3 = scmp.ne.s32.totalorder %s17_s10, %s242_s18  ;;  %p248_p5 = scmp.lt.s32.totalorder %s242_s18, %s242_s18 }
   0xb   :  { %p249_p6 = por %p248_p5, %p247_p4 }
   0xd   :  { %p250_p7 = pnand %p249_p6, %p243_p3 }
   0xf   :  { %253 = shalt.err (!%p250_p7)
}
  0x10   :  { %s281_s19 = smov 256   ;;  %s282_s20 = smov 16  }
  0x11   :  { %22 = dma.hbm_to_vmem [thread:$0]  %s339_s1, 4096, %s17_s10, [#allocation3], %s281_s19, %s281_s19, %s282_s20  }
  0x12   :  { %276 = dma.done.wait [#allocation3], 4096  }
  0x13   :  { %277 = vsyncadd [#allocation3], 4294963200  ;;  %v283_v0 = vmov 0   ;;  %v26_v1 = vld [vmem:[%s338_s0] sm:$0xff]  ;;  %v27_v2 = vld [vmem:[%s338_s0 + $0x8] sm:$0xff]  ;;  %v284_v7 = vmov 0.0   ;;  %v28_v52 = vlaneseq }
  0x14   :  { %231 = vset.pattern.permute.xlu0 %v283_v0  ;;  %v43_v3 = vld [vmem:[#allocation2 + $0x8] sm:$0xff]  ;;  %v45_v4 = vld [vmem:[#allocation2 + $0x18] sm:$0xff]  ;;  %v42_v5 = vld [vmem:[#allocation2] sm:$0xff]  ;;  %138 = vmatprep.mubr.f32.mxu0 %v284_v7  ;;  %v285_v55 = vmov 1.0   ;;  %s286_s0 = smov [#allocation5]  }
  0x15   :  { %31 = vperm.xlu0 %231, %v26_v1   ;;  %v44_v6 = vld [vmem:[#allocation2 + $0x10] sm:$0xff]  ;;  %v176_v8 = vpack.c.bf16 %v45_v4, %v43_v3  ;;  %v47_v10 = vld [vmem:[#allocation2 + $0x28] sm:$0xff]  ;;  %v49_v11 = vld [vmem:[#allocation2 + $0x38] sm:$0xff]  ;;  %144 = vmatprep.mubr.f32.mxu1 %v284_v7  ;;  %v29_v53 = vand.u32 127, %v28_v52  ;;  %s160_s1 = sshll.u32 %s286_s0, 4  ;;  %s161_s1 = int_to_ptr.vmem [resolvable:$true] %s160_s1 }
  0x16   :  { %v178_v9 = vpack.c.bf16 %v44_v6, %v42_v5  ;;  %v46_v12 = vld [vmem:[#allocation2 + $0x20] sm:$0xff]  ;;  %v180_v13 = vpack.c.bf16 %v49_v11, %v47_v10  ;;  %v48_v14 = vld [vmem:[#allocation2 + $0x30] sm:$0xff]  ;;  %v51_v15 = vld [vmem:[#allocation2 + $0x48] sm:$0xff]  ;;  %s254_s27 = scalar_lea.vmem %s161_s1, 512  ;;  %p259_p9 = scmp.lt.s32.totalorder %s161_s1, %s161_s1 }
  0x17   :  { %v53_v16 = vld [vmem:[#allocation2 + $0x58] sm:$0xff]  ;;  %177 = vmatprep.subr.bf16.mxu0 %v176_v8  ;;  %208 = vmatprep.subr.bf16.mxu1 %v176_v8  ;;  %v182_v17 = vpack.c.bf16 %v48_v14, %v46_v12  ;;  %v50_v19 = vld [vmem:[#allocation2 + $0x40] sm:$0xff]  ;;  %v52_v20 = vld [vmem:[#allocation2 + $0x50] sm:$0xff]  ;;  %p255_p8 = scmp.ne.s32.totalorder %s161_s1, %s254_s27  ;;  %p260_p10 = scmp.lt.s32.totalorder %s254_s27, %s254_s27 }
  0x18   :  { %179 = vmatpush1.bf16.msra.mxu0 %v178_v9  ;;  %216 = vmatpush1.bf16.msra.mxu1 %v178_v9  ;;  %v184_v18 = vpack.c.bf16 %v53_v16, %v51_v15  ;;  %v55_v21 = vld [vmem:[#allocation2 + $0x68] sm:$0xff]  ;;  %v57_v22 = vld [vmem:[#allocation2 + $0x78] sm:$0xff]  ;;  %v186_v23 = vpack.c.bf16 %v52_v20, %v50_v19  ;;  %v54_v25 = vld [vmem:[#allocation2 + $0x60] sm:$0xff] }
  0x19   :  { %34 = vperm.xlu0 %231, %v27_v2   ;;  %181 = vmatprep.subr.bf16.mxu0 %v180_v13  ;;  %v188_v24 = vpack.c.bf16 %v57_v22, %v55_v21  ;;  %v56_v26 = vld [vmem:[#allocation2 + $0x70] sm:$0xff]  ;;  %v59_v27 = vld [vmem:[#allocation2 + $0x88] sm:$0xff]  ;;  %v61_v28 = vld [vmem:[#allocation2 + $0x98] sm:$0xff]  ;;  %p261_p11 = por %p260_p10, %p259_p9 }
  0x1a   :  { %209 = vmatprep.subr.bf16.mxu1 %v180_v13  ;;  %v190_v29 = vpack.c.bf16 %v56_v26, %v54_v25  ;;  %v192_v30 = vpack.c.bf16 %v61_v28, %v59_v27  ;;  %v58_v31 = vld [vmem:[#allocation2 + $0x80] sm:$0xff]  ;;  %v60_v32 = vld [vmem:[#allocation2 + $0x90] sm:$0xff]  ;;  %v63_v33 = vld [vmem:[#allocation2 + $0xa8] sm:$0xff] }
  0x1b   :  { %v65_v34 = vld [vmem:[#allocation2 + $0xb8] sm:$0xff]  ;;  %v194_v35 = vpack.c.bf16 %v60_v32, %v58_v31  ;;  %v62_v37 = vld [vmem:[#allocation2 + $0xa0] sm:$0xff]  ;;  %v64_v38 = vld [vmem:[#allocation2 + $0xb0] sm:$0xff]  ;;  %p262_p12 = pnand %p261_p11, %p255_p8 }
  0x1c   :  { %183 = vmatpush1.bf16.msra.mxu0 %v182_v17  ;;  %217 = vmatpush1.bf16.msra.mxu1 %v182_v17  ;;  %v196_v36 = vpack.c.bf16 %v65_v34, %v63_v33  ;;  %v67_v39 = vld [vmem:[#allocation2 + $0xc8] sm:$0xff]  ;;  %v69_v40 = vld [vmem:[#allocation2 + $0xd8] sm:$0xff]  ;;  %v198_v41 = vpack.c.bf16 %v64_v38, %v62_v37  ;;  %v66_v43 = vld [vmem:[#allocation2 + $0xc0] sm:$0xff] }
  0x1d   :  { %185 = vmatprep.subr.bf16.mxu0 %v184_v18  ;;  %210 = vmatprep.subr.bf16.mxu1 %v184_v18  ;;  %v200_v42 = vpack.c.bf16 %v69_v40, %v67_v39  ;;  %v68_v44 = vld [vmem:[#allocation2 + $0xd0] sm:$0xff]  ;;  %v71_v45 = vld [vmem:[#allocation2 + $0xe8] sm:$0xff]  ;;  %v73_v46 = vld [vmem:[#allocation2 + $0xf8] sm:$0xff] }
  0x1e   :  { %v202_v47 = vpack.c.bf16 %v68_v44, %v66_v43  ;;  %v204_v48 = vpack.c.bf16 %v73_v46, %v71_v45  ;;  %v70_v49 = vld [vmem:[#allocation2 + $0xe0] sm:$0xff]  ;;  %v72_v50 = vld [vmem:[#allocation2 + $0xf0] sm:$0xff] }
  0x1f   :  { %v206_v51 = vpack.c.bf16 %v72_v50, %v70_v49 }
  0x20   :  { %187 = vmatpush1.bf16.msra.mxu0 %v186_v23  ;;  %218 = vmatpush1.bf16.msra.mxu1 %v186_v23 }
  0x21   :  { %189 = vmatprep.subr.bf16.mxu0 %v188_v24  ;;  %211 = vmatprep.subr.bf16.mxu1 %v188_v24 }
  0x24   :  { %191 = vmatpush1.bf16.msra.mxu0 %v190_v29  ;;  %219 = vmatpush1.bf16.msra.mxu1 %v190_v29 }
  0x25   :  { %193 = vmatprep.subr.bf16.mxu0 %v192_v30  ;;  %212 = vmatprep.subr.bf16.mxu1 %v192_v30 }
  0x28   :  { %195 = vmatpush1.bf16.msra.mxu0 %v194_v35  ;;  %220 = vmatpush1.bf16.msra.mxu1 %v194_v35 }
  0x29   :  { %197 = vmatprep.subr.bf16.mxu0 %v196_v36  ;;  %213 = vmatprep.subr.bf16.mxu1 %v196_v36 }
  0x2c   :  { %199 = vmatpush1.bf16.msra.mxu0 %v198_v41  ;;  %221 = vmatpush1.bf16.msra.mxu1 %v198_v41 }
  0x2d   :  { %201 = vmatprep.subr.bf16.mxu0 %v200_v42  ;;  %214 = vmatprep.subr.bf16.mxu1 %v200_v42 }
  0x30   :  { %203 = vmatpush1.bf16.msra.mxu0 %v202_v47  ;;  %222 = vmatpush1.bf16.msra.mxu1 %v202_v47 }
  0x31   :  { %205 = vmatprep.subr.bf16.mxu0 %v204_v48  ;;  %215 = vmatprep.subr.bf16.mxu1 %v204_v48 }
  0x34   :  { %207 = vmatpush1.bf16.msra.mxu0 %v206_v51  ;;  %223 = vmatpush1.bf16.msra.mxu1 %v206_v51 }
  0x94   :  { %v32_v54 = vpop.permute.xlu0 %31 }
  0x95   :  { %vm36_vm0 = vcmp.eq.s32.totalorder %v29_v53, %v32_v54 }
  0x96   :  { %174 = vmatmul.mubr.msk.f32.vlgmr.msra.gmra.mrb[0].mxu0 %vm36_vm0, %v285_v55 }
  0x98   :  { %v35_v56 = vpop.permute.xlu0 %34 }
  0x99   :  { %vm37_vm1 = vcmp.eq.s32.totalorder %v29_v53, %v35_v56 }
  0x9a   :  { %175 = vmatmul.mubr.msk.f32.vlgmr.msra.gmra.mrb[0].mxu1 %vm37_vm1, %v285_v55 }
 0x169   :  { %v140_v57 = vpop.f32.mrb[0].mxu0 }
 0x16a   :  { %151 = vst [vmem:[#allocation5] sm:$0xff] %v140_v57  ;;  %v142_v58 = vpop.f32.mrb[1].mxu0 }
 0x16b   :  { %152 = vst [vmem:[#allocation5 + $0x8] sm:$0xff] %v142_v58 }
 0x16d   :  { %v146_v59 = vpop.f32.mrb[0].mxu1 }
 0x16e   :  { %153 = vst [vmem:[#allocation5 + $0x10] sm:$0xff] %v146_v59  ;;  %v148_v60 = vpop.f32.mrb[1].mxu1 }
 0x16f   :  { %154 = vst [vmem:[#allocation5 + $0x18] sm:$0xff] %v148_v60 }
 0x170   :  { %265 = shalt.err (!%p262_p12)
}
 0x171   :  { %s266_s30 = scalar_lea.hbm %s340_s2, 512 }
 0x172   :  { %p267_p13 = scmp.ne.s32.totalorder %s340_s2, %s266_s30  ;;  %p270_p0 = scmp.lt.u32.totalorder %s266_s30, %s340_s2 }
 0x174   :  { %p272_p1 = pnand %p270_p0, %p267_p13 }
 0x176   :  { %275 = shalt.err (!%p272_p1)
}
 0x177   :  { %166 = dma.vmem_to_hbm [thread:$0]  %s161_s1, 512, %s340_s2, [#allocation4], %s281_s19, %s281_s19, %s282_s20  }
 0x178   :  { %278 = dma.done.wait [#allocation4], 512  }
 0x179   :  { %279 = vsyncadd [#allocation4], 4294966784 }
 0x17a   :  { %170 = vsyncpa [#allocation3], 1 }
 0x17b   :  { %171 = vsyncpa [#allocation4], 1 }

</bundles_post_ra>
